<compile_context>
chip_gen: v7x
topology: tpu7x:2x2x1
jax: 0.10.0
libtpu: 0.0.40
codegen_flags: <defaults>
</compile_context>

<pallas_src>
import functools

import jax
import jax.numpy as jnp
from jax.experimental import pallas as pl
from jax.experimental.pallas import tpu as pltpu


def _mse_masked_kernel(len_ref, x_ref, t_ref, out_ref, acc_ref, *, d, sub):
    """Grid = (batch, row_tiles). x_ref/t_ref: (TR, C) tile of one sample."""
    b = pl.program_id(0)
    r = pl.program_id(1)

    @pl.when(r == 0)
    def _init():
        acc_ref[...] = jnp.zeros_like(acc_ref)

    tr, c = x_ref.shape

    # Number of valid flat elements in this sample: length * D.
    limit = len_ref[b] * d

    # Global flat index (within the sample) of every element in this tile.
    row0 = r * tr
    flat = (row0 + jax.lax.broadcasted_iota(jnp.int32, (tr, c), 0)) * c \
        + jax.lax.broadcasted_iota(jnp.int32, (tr, c), 1)

    x = x_ref[...].astype(jnp.float32)
    y = t_ref[...].astype(jnp.float32)

    # (x*mask - y*mask) == (x - y) on kept elements, 0 elsewhere (mask in {0,1}).
    # A select also neutralizes any unspecified data in padded tail blocks.
    diff = jnp.where(flat < limit, x - y, jnp.float32(0.0))
    sq = diff * diff

    # Accumulate vreg-shaped partial sums: pure VPU adds, no XLU reduce here.
    if tr == sub:
        acc_ref[...] += sq
    else:
        acc_ref[...] += sq.reshape(tr // sub, sub, c).sum(axis=0)

    @pl.when(r == pl.num_programs(1) - 1)
    def _flush():
        out_ref[...] = acc_ref[...]


def mse_loss_masked(inputs, targets, lengths, *,
                    target_block_bytes=2 * 1024 * 1024):
    """inputs, targets: (B, L, D); lengths: (B,) int -> scalar loss."""
    B, L, D = inputs.shape
    assert targets.shape == inputs.shape

    # Clamp so the analytic mask sum matches sum(mask) even if length > L.
    lengths = jnp.minimum(lengths.astype(jnp.int32), jnp.int32(L))

    LD = L * D
    if LD % 128 == 0:
        # Lane-dense layout: fold (L, D) -> (R, 128). Row-major reshape is free.
        C = 128
        R = LD // 128
        x = inputs.reshape(B, R, C)
        t = targets.reshape(B, R, C)
    else:
        # Fallback: native layout (correct; lane-sparse if D < 128).
        C = D
        R = L
        x = inputs
        t = targets

    # Row-tile sizing: keep 2 inputs x 2 pipeline buffers comfortably inside
    # the scoped-VMEM defaults of v5e (16 MiB), v6e (32 MiB) and v7x (32 MiB),
    # while each DMA stays large enough to approach the HBM roofline.
    itemsize = jnp.dtype(inputs.dtype).itemsize
    max_rows = max(1, target_block_bytes // (C * itemsize))
    if max_rows >= R:
        TR = R
    else:
        TR = max(8, (max_rows // 8) * 8)      # keep sublane dim a multiple of 8
    SUB = 8 if TR % 8 == 0 else TR            # shape of the resident accumulator
    n_r = pl.cdiv(R, TR)

    kernel = functools.partial(_mse_masked_kernel, d=D, sub=SUB)

    partials = pl.pallas_call(
        kernel,
        out_shape=jax.ShapeDtypeStruct((B, SUB, C), jnp.float32),
        grid_spec=pltpu.PrefetchScalarGridSpec(
            num_scalar_prefetch=1,            # lengths -> SMEM
            grid=(B, n_r),
            in_specs=[
                pl.BlockSpec((None, TR, C), lambda b, r, lens: (b, r, 0)),
                pl.BlockSpec((None, TR, C), lambda b, r, lens: (b, r, 0)),
            ],
            out_specs=pl.BlockSpec((None, SUB, C), lambda b, r, lens: (b, 0, 0)),
            scratch_shapes=[pltpu.VMEM((SUB, C), jnp.float32)],
        ),
        compiler_params=pltpu.CompilerParams(
            # batch axis parallel (megacore on v7x), reduction axis arbitrary.
            dimension_semantics=("parallel", "arbitrary"),
            vmem_limit_bytes=32 * 1024 * 1024,
        ),
    )(lengths, x, t)

    sq_sum = jnp.sum(partials)
    # sum(mask) == sum(min(length, L)) * D exactly; no in-kernel work needed.
    # (NaN if all lengths are zero — same as the PyTorch module.)
    mask_sum = jnp.sum(lengths).astype(jnp.float32) * jnp.float32(D)
    return sq_sum / mask_sum


def _reference(inputs, targets, lengths):
    B, L, D = inputs.shape
    mask = (jnp.arange(L)[None, :] < lengths[:, None]).astype(jnp.float32)
    mask = jnp.broadcast_to(mask[:, :, None], (B, L, D))
    diff = inputs * mask - targets * mask
    return jnp.sum(diff * diff) / jnp.sum(mask)


if __name__ == "__main__":
    key = jax.random.PRNGKey(0)

    # 1) Module-sized demo: B=2, L=8, D=32 (lane-dense path, single row tile).
    k1, k2 = jax.random.split(key)
    B, L, D = 2, 8, 32
    x = jax.random.normal(k1, (B, L, D), dtype=jnp.float32)
    t = jax.random.normal(k2, (B, L, D), dtype=jnp.float32)
    lens = jnp.array([8, 5], dtype=jnp.int32)
    out = jax.block_until_ready(mse_loss_masked(x, t, lens))
    ref = _reference(x, t, lens)
    assert jnp.allclose(out, ref, rtol=1e-5, atol=1e-6), (out, ref)

    # 2) Multi-tile reduction (small block target forces grid=(B, >1) and the
    #    stacked vreg-accumulation path).
    k3, k4 = jax.random.split(k2)
    B, L, D = 2, 128, 32
    x = jax.random.normal(k3, (B, L, D), dtype=jnp.float32)
    t = jax.random.normal(k4, (B, L, D), dtype=jnp.float32)
    lens = jnp.array([128, 50], dtype=jnp.int32)
    out = jax.block_until_ready(
        mse_loss_masked(x, t, lens, target_block_bytes=8192))
    ref = _reference(x, t, lens)
    assert jnp.allclose(out, ref, rtol=1e-5, atol=1e-6), (out, ref)

    # 3) Fallback layout when L*D is not a multiple of 128.
    k5, k6 = jax.random.split(k4)
    B, L, D = 2, 5, 24
    x = jax.random.normal(k5, (B, L, D), dtype=jnp.float32)
    t = jax.random.normal(k6, (B, L, D), dtype=jnp.float32)
    lens = jnp.array([5, 2], dtype=jnp.int32)
    out = jax.block_until_ready(mse_loss_masked(x, t, lens))
    ref = _reference(x, t, lens)
    assert jnp.allclose(out, ref, rtol=1e-5, atol=1e-6), (out, ref)

    print("KERNEL_OK")
</pallas_src>

<mosaic_0001>
module attributes {stable_mosaic.version = 11 : i64} {
  func.func @_mse_masked_kernel(%arg0: i32, %arg1: i32, %arg2: memref<2xi32, #tpu.memory_space<smem>>, %arg3: memref<1x2x128xf32, #tpu.memory_space<vmem>>, %arg4: memref<1x2x128xf32, #tpu.memory_space<vmem>>, %arg5: memref<1x2x128xf32, #tpu.memory_space<vmem>>, %arg6: memref<2x128xf32, #tpu.memory_space<vmem>>) attributes {dimension_semantics = [#tpu.dimension_semantics<parallel>, #tpu.dimension_semantics<arbitrary>], iteration_bounds = array<i64: 2, 1>, scalar_prefetch = 1 : i64, scratch_operands = 1 : i64, tpu.core_type = #tpu.core_type<tc>, window_params = [{transform_indices = @transform_0, window_bounds = array<i64: 1, 2, 128>}, {transform_indices = @transform_1, window_bounds = array<i64: 1, 2, 128>}, {transform_indices = @transform_2, window_bounds = array<i64: 1, 2, 128>}]} {
    %c0_i32 = arith.constant 0 : i32
    %0 = arith.cmpi eq, %arg1, %c0_i32 : i32
    %1 = arith.extui %0 : i1 to i32
    %c0_i32_0 = arith.constant 0 : i32
    %2 = arith.cmpi ne, %1, %c0_i32_0 : i32
    scf.if %2 {
      %cst_12 = arith.constant 0.000000e+00 : f32
      %30 = vector.broadcast %cst_12 : f32 to vector<2x128xf32>
      %c0_13 = arith.constant 0 : index
      %c0_14 = arith.constant 0 : index
      %31 = vector.load %arg6[%c0_13, %c0_14] : memref<2x128xf32, #tpu.memory_space<vmem>>, vector<2x128xf32>
      tpu.vector_store %arg6[%c0_13, %c0_14], %30 {strides = array<i32>} : memref<2x128xf32, #tpu.memory_space<vmem>>, vector<2x128xf32>,
    } else {
    }
    %3 = arith.index_cast %arg0 : i32 to index
    %4 = memref.load %arg2[%3] : memref<2xi32, #tpu.memory_space<smem>>
    %c32_i32 = arith.constant 32 : i32
    %5 = arith.muli %4, %c32_i32 : i32
    %c2_i32 = arith.constant 2 : i32
    %6 = arith.muli %arg1, %c2_i32 : i32
    %7 = tpu.iota {dimensions = array<i32: 0>} : vector<2x128xi32>
    %8 = vector.broadcast %6 : i32 to vector<2x128xi32>
    %9 = arith.addi %8, %7 : vector<2x128xi32>
    %c128_i32 = arith.constant 128 : i32
    %10 = vector.broadcast %c128_i32 : i32 to vector<2x128xi32>
    %11 = arith.muli %9, %10 : vector<2x128xi32>
    %12 = tpu.iota {dimensions = array<i32: 1>} : vector<2x128xi32>
    %13 = arith.addi %11, %12 : vector<2x128xi32>
    %c0 = arith.constant 0 : index
    %c0_1 = arith.constant 0 : index
    %c0_2 = arith.constant 0 : index
    %14 = vector.load %arg3[%c0, %c0_1, %c0_2] : memref<1x2x128xf32, #tpu.memory_space<vmem>>, vector<1x2x128xf32>
    %15 = vector.shape_cast %14 : vector<1x2x128xf32> to vector<2x128xf32>
    %c0_3 = arith.constant 0 : index
    %c0_4 = arith.constant 0 : index
    %c0_5 = arith.constant 0 : index
    %16 = vector.load %arg4[%c0_3, %c0_4, %c0_5] : memref<1x2x128xf32, #tpu.memory_space<vmem>>, vector<1x2x128xf32>
    %17 = vector.shape_cast %16 : vector<1x2x128xf32> to vector<2x128xf32>
    %18 = vector.broadcast %5 : i32 to vector<2x128xi32>
    %19 = arith.cmpi slt, %13, %18 : vector<2x128xi32>
    %20 = arith.subf %15, %17 : vector<2x128xf32>
    %cst = arith.constant 0.000000e+00 : f32
    %21 = vector.broadcast %cst : f32 to vector<2x128xf32>
    %22 = arith.select %19, %20, %21 : vector<2x128xi1>, vector<2x128xf32>
    %23 = arith.mulf %22, %22 : vector<2x128xf32>
    %c0_6 = arith.constant 0 : index
    %c0_7 = arith.constant 0 : index
    %24 = vector.load %arg6[%c0_6, %c0_7] : memref<2x128xf32, #tpu.memory_space<vmem>>, vector<2x128xf32>
    %25 = arith.addf %24, %23 : vector<2x128xf32>
    %c0_8 = arith.constant 0 : index
    %c0_9 = arith.constant 0 : index
    %26 = vector.load %arg6[%c0_8, %c0_9] : memref<2x128xf32, #tpu.memory_space<vmem>>, vector<2x128xf32>
    tpu.vector_store %arg6[%c0_8, %c0_9], %25 {strides = array<i32>} : memref<2x128xf32, #tpu.memory_space<vmem>>, vector<2x128xf32>,
    %c0_i32_10 = arith.constant 0 : i32
    %27 = arith.cmpi eq, %arg1, %c0_i32_10 : i32
    %28 = arith.extui %27 : i1 to i32
    %c0_i32_11 = arith.constant 0 : i32
    %29 = arith.cmpi ne, %28, %c0_i32_11 : i32
    scf.if %29 {
      %c0_12 = arith.constant 0 : index
      %c0_13 = arith.constant 0 : index
      %30 = vector.load %arg6[%c0_12, %c0_13] : memref<2x128xf32, #tpu.memory_space<vmem>>, vector<2x128xf32>
      %c0_14 = arith.constant 0 : index
      %c0_15 = arith.constant 0 : index
      %c0_16 = arith.constant 0 : index
      %31 = vector.load %arg5[%c0_14, %c0_15, %c0_16] : memref<1x2x128xf32, #tpu.memory_space<vmem>>, vector<1x2x128xf32>
      %32 = vector.shape_cast %31 : vector<1x2x128xf32> to vector<2x128xf32>
      %33 = vector.shape_cast %30 : vector<2x128xf32> to vector<1x2x128xf32>
      tpu.vector_store %arg5[%c0_14, %c0_15, %c0_16], %33 {strides = array<i32>} : memref<1x2x128xf32, #tpu.memory_space<vmem>>, vector<1x2x128xf32>,
    } else {
    }
    return
  }
  func.func @transform_0(%arg0: i32, %arg1: i32, %arg2: memref<2xi32, #tpu.memory_space<smem>>) -> (i32, i32, i32) {
    %c0_i32 = arith.constant 0 : i32
    %c0_i32_0 = arith.constant 0 : i32
    return %arg0, %arg1, %c0_i32 : i32, i32, i32
  }
  func.func @transform_1(%arg0: i32, %arg1: i32, %arg2: memref<2xi32, #tpu.memory_space<smem>>) -> (i32, i32, i32) {
    %c0_i32 = arith.constant 0 : i32
    %c0_i32_0 = arith.constant 0 : i32
    return %arg0, %arg1, %c0_i32 : i32, i32, i32
  }
  func.func @transform_2(%arg0: i32, %arg1: i32, %arg2: memref<2xi32, #tpu.memory_space<smem>>) -> (i32, i32, i32) {
    %c0_i32 = arith.constant 0 : i32
    %c0_i32_0 = arith.constant 0 : i32
    %c0_i32_1 = arith.constant 0 : i32
    return %arg0, %c0_i32, %c0_i32_0 : i32, i32, i32
  }
}

</mosaic_0001>

<bundles_post_ra>
// kernel: tpu_custom_call.1
= control target key start
LH: loop header
LB: loop body
LE: loop exit
PB: predicated region body
PF: predicated region fallthrough
CT: control target
= control target key end

     0   :  { %s765_s0 = inlined_call_operand.hbm [shape: s32[2], index: 0, kind: input, shape index: {}]   ;;  %s766_s1 = inlined_call_operand.hbm [shape: f32[2,2,128], index: 1, kind: input, shape index: {}]   ;;  %s767_s2 = inlined_call_operand.vmem [shape: f32[2,2,128], index: 2, kind: input, shape index: {}]   ;;  %s768_s3 = inlined_call_operand.hbm [shape: f32[2,2,128], index: 3, kind: output, shape index: {}]  }
   0x1   :  { %s425_s14 = scalar_lea.hbm %s765_s0, 16 }
   0x2   :  { %p426_p0 = scmp.ne.s32.totalorder %s765_s0, %s425_s14  ;;  %p429_p1 = scmp.lt.u32.totalorder %s425_s14, %s765_s0 }
   0x4   :  { %p431_p2 = pnand %p429_p1, %p426_p0 }
   0x6   :  { %434 = shalt.err (!%p431_p2)  }
   0x7   :  { %s551_s19 = smov [#allocation4]  }
   0x8   :  { %9 = dma.hbm_to_smem %s765_s0, 16, %s551_s19, [#allocation3] }
   0x9   :  { %517 = dma.done.wait [#allocation3], 16 }
   0xa   :  { %518 = vsyncadd [#allocation3], 4294967280 }
   0xb   :  { %11 = sfence }
   0xc   :  { %12 = vsyncpa [#allocation6], 0 }
   0xd   :  { %14 = vsyncpa [#allocation6 + $0x1], 0 }
   0xe   :  { %15 = vsyncpa [#allocation7], 0 }
   0xf   :  { %17 = vsyncpa [#allocation7 + $0x1], 0  ;;  %s587_s22 = smov 0   ;;  %s589_s23 = smov 0  }
  0x10   :  { %s591_s24 = smov 0   ;;  %s593_s25 = smov 0  }
  0x11   :  { %s595_s26 = smov 0   ;;  %s597_s27 = smov 0  }
  0x12 LB: > { %s346_s0 = sadd.s32 4294967295, %s549_s27   ;;  %s347_s28 = sadd.s32 4294967294, %s549_s27   ;;  %s549_s27 = sphi %s597_s27, %s23_s27   ;;  %s545_s26 = sphi %s595_s26, %s784_s26   ;;  %s541_s25 = sphi %s593_s25, %s783_s25   ;;  %s537_s24 = sphi %s591_s24, %s782_s24   ;;  %s533_s23 = sphi %s589_s23, %s781_s23   ;;  %s529_s22 = sphi %s587_s22, %s780_s22  }
  0x13   : > { %s35_s29 = sadd.s32 1, %s545_s26  ;;  %s44_s30 = sadd.s32 1, %s537_s24 }
  0x14   : > { %p37_p3 = scmp.ge.s32.totalorder %s35_s29, 2  ;;  %p51_p4 = scmp.ne.s32.totalorder %s537_s24, %s533_s23 }
  0x15   : > { %p52_p5 = scmp.eq.s32.totalorder %s549_s27, 0  ;;  %p57_p6 = scmp.ne.s32.totalorder %s533_s23, %s529_s22 }
  0x16   : > { %s786_s29 = smov (%p37_p3, %s35_s29), 0  ;;  %p58_p8 = scmp.eq.s32.totalorder %s346_s0, 0 }
  0x17   : > { %p628_p7 = por %p52_p5, %p51_p4  ;;  %s39_s5 = ssub.s32 %s545_s26, %s786_s29 }
  0x18   : > { %p109_p9 = scmp.eq.s32.totalorder %s346_s0, 1  ;;  %p42_p10 = scmp.eq.s32.totalorder %s39_s5, 0 }
  0x19   : > { %p634_p11 = por %p58_p8, %p57_p6  ;;  %p115_p13 = scmp.eq.s32.totalorder %s347_s28, 1 }
  0x1a   : > { %p638_p12 = por %p109_p9, %p51_p4  ;;  %p373_p2 = scmp.lt.s32.totalorder %s549_s27, 2 }
  0x1b   : > { %s643_s8 = scalar_select %p42_p10, %s537_s24, %s44_s30  }
  0x1c   : > { %s772_s7 = scalar_select %p638_p12, 1, 0 }
  0x1d   : > { %p645_p0 = por %p115_p13, %p57_p6  ;;  %s135_s10 = sand.u32 1, %s537_s24  }
  0x1e   : > { %s350_s11 = sshll.u32 %s135_s10, 1  ;;  %s351_s12 = sshll.u32 %s545_s26, 5 }
  0x1f   : > { %s773_s9 = scalar_select %p645_p0, 1, 0 }
  0x20   : > { %s656_s15 = scalar_lea.hbm %s766_s1, %s351_s12  ;;  %s139_s16 = scalar_lea.vmem [#allocation5], %s350_s11 }
  0x21   : > { %s147_s17 = sshll.u32 %s139_s16, 4  ;;  %p662_p3 = pnand %p373_p2, %p628_p7  ;;  %s658_s17 = int_to_ptr.vmem [resolvable:$true] %s147_s17 }
  0x22   : > { %s136_s19 = scalar_lea.sflag [#allocation6], %s135_s10  ;;  %s435_s20 = scalar_lea.hbm %s656_s15, 32 }
  0x23   : > { %p436_p6 = scmp.ne.s32.totalorder %s656_s15, %s435_s20  ;;  %p437_p8 = pneg %p662_p3 }
  0x24   : > { %s440_s28 = scalar_lea.hbm %s766_s1, 64  ;;  %p441_p7 = scmp.lt.u32.totalorder %s656_s15, %s766_s1 }
  0x25   : > { %p438_p9 = pnand %p437_p8, %p436_p6  ;;  %p442_p13 = scmp.lt.u32.totalorder %s440_s28, %s435_s20 }
  0x26   : > { %p444_p1 = scmp.lt.u32.totalorder %s435_s20, %s656_s15 }
  0x27   : > { %p439_p10 = pneg %p438_p9  ;;  %p443_p2 = por %p442_p13, %p441_p7 }
  0x29   : > { %p445_p4 = por %p444_p1, %p443_p2 }
  0x2b   : > { %p446_p5 = pnand %p445_p4, %p439_p10 }
  0x2d   : > { %449 = shalt.err (!%p446_p5)
}
  0x2e   : > { %s450_s5 = scalar_lea.vmem %s658_s17, 32  ;;  %s552_s10 = smov [#allocation5]  }
  0x2f   : > { %p451_p6 = scmp.ne.s32.totalorder %s658_s17, %s450_s5  ;;  %s455_s11 = sshll.u32 %s552_s10, 4  ;;  %s456_s11 = int_to_ptr.vmem [resolvable:$false] %s455_s11 }
  0x30   : > { %s457_s12 = scalar_lea.vmem %s456_s11, 64  ;;  %p458_p12 = scmp.lt.s32.totalorder %s658_s17, %s456_s11 }
  0x31   : > { %p453_p9 = pnand %p451_p6, %p437_p8  ;;  %p459_p7 = scmp.lt.s32.totalorder %s457_s12, %s450_s5 }
  0x33   : > { %p454_p0 = pneg %p453_p9  ;;  %p460_p13 = por %p459_p7, %p458_p12 }
  0x35   : > { %p461_p1 = pnand %p460_p13, %p454_p0 }
  0x37   : > { %464 = shalt.err (!%p461_p1)
}
  0x38   : > { %368 = dma.hbm_to_vmem [thread:$0]  (!%p662_p3), %s656_s15, 32, %s658_s17, %s136_s19  }
  0x39   : > { %p775_p4 = scmp.lt.s32.totalorder %s549_s27, 3  ;;  %p776_p5 = scmp.ge.s32.totalorder %s549_s27, 1 }
  0x3b   : > { %p163_p8 = pnand %p776_p5, %p775_p4 }
  0x3c   : > { %s698_s13 = sand.u32 (!%p163_p8), 1, %s533_s23  }
  0x3d   : > { %166 = sbr.rel (%p163_p8) target bundleno = 105 (0x69), region = 28  ;;  %s353_s14 = sshll.u32 (!%p163_p8), %s698_s13, 1 }
  0x3e   : > { %s169_s16 = scalar_lea.sflag (!%p163_p8), [#allocation6], %s698_s13  ;;  %s172_s20 = scalar_lea.vmem (!%p163_p8), [#allocation5], %s353_s14 }
  0x44   : > { %520 = dma.done.wait (%p634_p11), %s169_s16, 32  }
  0x45   : > { %522 = vsyncadd (%p634_p11), %s169_s16, 4294967264  ;;  %p200_p12 = scmp.lt.s32.totalorder %s541_s25, 1  ;;  %v215_v0 = vlaneseq  ;;  %v553_v1 = vmov 0.0   ;;  %s212_s15 = sld [smem:[#allocation4 + %s541_s25]]  ;;  %v223_v6 = vld [vmem:[%s172_s20] sm:$0x3] }
  0x46   : > { %211 = vst [vmem:[#allocation2] sm:$0x3] %v553_v1  ;;  %s199_s28 = scalar_lea.vmem [#allocation8], %s353_s14  ;;  %s358_s4 = sshll.u32 %s541_s25, 5 }
  0x47   : > { %s201_s17 = scalar_select %p200_p12, %s541_s25, 1  ;;  %v216_v2 = vshrl.u32 %v215_v0, 7  ;;  %v221_v3 = vand.u32 127, %v215_v0 }
  0x48   : > { %s252_s30 = sshll.u32 %s199_s28, 4  ;;  %s718_s11 = scalar_lea.hbm %s768_s3, %s358_s4  ;;  %s713_s30 = int_to_ptr.vmem [resolvable:$true] %s252_s30 }
  0x49   : > { %s355_s18 = sshll.u32 %s201_s17, 1  ;;  %v219_v4 = vmul.u32 128, %v216_v2  ;;  %s239_s12 = scalar_lea.sflag [#allocation7], %s698_s13 }
  0x4a   : > { %s206_s0 = scalar_lea.vmem %s767_s2, %s355_s18  ;;  %s465_s16 = scalar_lea.vmem %s713_s30, 32 }
  0x4b   : > { %v222_v5 = vadd.s32 %v221_v3, %v219_v4  ;;  %s356_s6 = sshll.u32 %s212_s15, 5  ;;  %v224_v7 = vld [vmem:[%s206_s0] sm:$0x3]  ;;  %p466_p11 = scmp.ne.s32.totalorder %s713_s30, %s465_s16 }
  0x4c   : > { %v225_v8 = vstv %s356_s6  ;;  %v227_v9 = vsub.f32 %v223_v6, %v224_v7  ;;  %p777_p0 = scmp.ne.s32.totalorder %s772_s7, 0  ;;  %s554_s14 = smov [#allocation8]  }
  0x4d   : > { %vm226_vm0 = vcmp.lt.s32.totalorder %v222_v5, %v225_v8  ;;  %v230_v11 = vld [vmem:[#allocation2] sm:$0x3]  ;;  %s469_s25 = sshll.u32 %s554_s14, 4  ;;  %s470_s25 = int_to_ptr.vmem [resolvable:$false] %s469_s25 }
  0x4e   : > { %v228_v10 = vsel %vm226_vm0, %v227_v9, 0.0  ;;  %p467_p3 = pnand %p466_p11, %p777_p0  ;;  %s471_s20 = scalar_lea.vmem %s470_s25, 64 }
  0x4f   : > { %v229_v12 = vmul.f32 %v228_v10, %v228_v10  ;;  %p472_p2 = scmp.lt.s32.totalorder %s713_s30, %s470_s25  ;;  %p473_p6 = scmp.lt.s32.totalorder %s471_s20, %s465_s16 }
  0x50   : > { %p468_p10 = pneg %p467_p3 }
  0x51   : > { %v231_v13 = vadd.f32 %v230_v11, %v229_v12  ;;  %p474_p9 = por %p473_p6, %p472_p2 }
  0x53   : > { %232 = vst [vmem:[#allocation2] sm:$0x3] %v231_v13  ;;  %p475_p7 = pnand %p474_p9, %p468_p10 }
  0x5a   : > { %v236_v14 = vld [vmem:[#allocation2] sm:$0x3] }
  0x5b   : > { %237 = vst [vmem:[%s199_s28] sm:$0x3] %v236_v14 }
  0x5c   : > { %478 = shalt.err (!%p475_p7)
}
  0x5d   : > { %s479_s13 = scalar_lea.hbm %s718_s11, 32  ;;  %s483_s18 = scalar_lea.hbm %s768_s3, 64 }
  0x5e   : > { %p480_p13 = scmp.ne.s32.totalorder %s718_s11, %s479_s13  ;;  %p484_p5 = scmp.lt.u32.totalorder %s718_s11, %s768_s3 }
  0x5f   : > { %p485_p8 = scmp.lt.u32.totalorder %s483_s18, %s479_s13  ;;  %p487_p11 = scmp.lt.u32.totalorder %s479_s13, %s718_s11 }
  0x60   : > { %p481_p1 = pnand %p480_p13, %p777_p0 }
  0x61   : > { %p486_p12 = por %p485_p8, %p484_p5 }
  0x62   : > { %p482_p4 = pneg %p481_p1 }
  0x63   : > { %p488_p3 = por %p487_p11, %p486_p12 }
  0x65   : > { %p489_p10 = pnand %p488_p3, %p482_p4 }
  0x67   : > { %492 = shalt.err (!%p489_p10)
}
  0x68   : > { %363 = dma.vmem_to_hbm [thread:$0]  (%p777_p0), %s713_s30, 32, %s718_s11, %s239_s12  }
  0x69 PF: > { %s264_s0 = sand.u32 1, %s529_s22   ;;  %p778_p2 = scmp.ne.s32.totalorder %s773_s9, 0 }
  0x6a   : > { %p779_p6 = scmp.ge.s32.totalorder %s549_s27, 2  ;;  %s265_s6 = scalar_lea.sflag [#allocation7], %s264_s0 }
  0x6c   : > { %p370_p9 = pnand %p779_p6, %p778_p2 }
  0x6e   : > { %524 = dma.done.wait (!%p370_p9), %s265_s6, 32  }
  0x6f   : > { %526 = vsyncadd (!%p370_p9), %s265_s6, 4294967264  ;;  %s23_s27 = sadd.s32 1, %s549_s27   ;;  %s780_s22 = smov %s533_s23 }
  0x70   : > { %p20_p7 = scmp.ge.s32.totalorder %s23_s27, 4   ;;  %s781_s23 = smov %s537_s24 }
  0x71   : > { %s782_s24 = smov %s643_s8  ;;  %s783_s25 = smov %s545_s26 }
  0x72   : > { %s784_s26 = smov %s786_s29  ;;  %22 = sbr.rel (!%p20_p7) target bundleno = 18 (0x12), region = 84 }
  0x79   :  { %270 = vsyncpa [#allocation6], 1 }
  0x7a   :  { %272 = vsyncpa [#allocation6 + $0x1], 1 }
  0x7b   :  { %273 = vsyncpa [#allocation7], 1 }
  0x7c   :  { %275 = vsyncpa [#allocation7 + $0x1], 1 }

</bundles_post_ra>
